<compile_context>
chip_gen: v6e
topology: v6e:2x2x1
jax: 0.10.0
libtpu: 0.0.40
codegen_flags: <defaults>
</compile_context>

<pallas_src>
import functools
import math

import jax
import jax.numpy as jnp
from jax import lax
from jax.experimental import pallas as pl
from jax.experimental.pallas import tpu as pltpu


def _combined_loss_kernel(pred_ref, target_ref, out_ref, acc_ref, *,
                          smoothing, cos_m, sin_m, scale, alpha,
                          n_valid, n_classes):
    i = pl.program_id(0)

    @pl.when(i == 0)
    def _init():
        acc_ref[0] = 0.0
        acc_ref[1] = 0.0

    pred = pred_ref[...].astype(jnp.float32)          # (TB, C)
    tgt = target_ref[...]                             # (TB, 1) int32
    TB, C = pred.shape

    # Valid-row mask (handles batch padding to a multiple of the tile).
    row_ids = i * TB + lax.broadcasted_iota(jnp.int32, (TB, 1), 0)
    valid = (row_ids < n_valid).astype(jnp.float32)   # (TB, 1)

    classes = lax.broadcasted_iota(jnp.int32, (TB, C), 1)
    is_target = classes == tgt                        # (TB, C) bool, one True per row

    # ---- per-row statistics (single pass each over the class axis) ----
    row_sum = jnp.sum(pred, axis=1, keepdims=True)                        # sum_c pred
    row_max = jnp.max(pred, axis=1, keepdims=True)
    lse = jnp.log(jnp.sum(jnp.exp(pred - row_max), axis=1, keepdims=True)) + row_max
    sq_sum = jnp.sum(pred * pred, axis=1, keepdims=True)                  # ||row||^2
    pred_t = jnp.sum(jnp.where(is_target, pred, 0.0), axis=1, keepdims=True)

    # ---- label-smoothing cross entropy, collapsed to per-row scalars ----
    # sum_c -smooth_oh * logp = -(1-s)*(pred_t - lse) - (s/C)*(sum_c pred - C*lse)
    ls_row = (-(1.0 - smoothing) * (pred_t - lse)
              - (smoothing / n_classes) * (row_sum - jnp.float32(C) * lse))

    # ---- ArcFace additive angular margin, per-row margin math ----
    inv_norm = pl.reciprocal(jnp.maximum(jnp.sqrt(sq_sum), 1e-12), approx=False)
    cos_t = pred_t * inv_norm                                             # (TB, 1)
    sin_t = jnp.sqrt(jnp.clip(1.0 - cos_t * cos_t, 0.0, 1.0))
    phi_t = cos_t * cos_m - sin_t * sin_m                                 # (TB, 1)

    # Margin logits: scale*cosine everywhere, target column replaced by scale*phi_t.
    scaled = jnp.where(is_target, scale * phi_t, (scale * inv_norm) * pred)  # (TB, C)
    m2 = jnp.max(scaled, axis=1, keepdims=True)
    lse2 = jnp.log(jnp.sum(jnp.exp(scaled - m2), axis=1, keepdims=True)) + m2
    arc_row = lse2 - scale * phi_t                                        # -logp[target]

    acc_ref[0] += jnp.sum(ls_row * valid)
    acc_ref[1] += jnp.sum(arc_row * valid)

    @pl.when(i == pl.num_programs(0) - 1)
    def _finalize():
        inv_b = 1.0 / n_valid
        out_ref[0, 0] = (alpha * acc_ref[0] + (1.0 - alpha) * acc_ref[1]) * inv_b


def _choose_tile_b(b_rows, n_classes, itemsize, budget_bytes=8 << 20):
    # Keep one (TILE_B, C) input tile around <=8 MiB so double-buffering stays well
    # inside the scoped-VMEM limit on every generation (incl. v7x's smaller VMEM).
    rows = max(8, budget_bytes // max(1, n_classes * itemsize))
    rows = max(8, (rows // 8) * 8)
    rows = min(rows, 1024)
    b_rounded = ((b_rows + 7) // 8) * 8
    return min(rows, b_rounded)


def combined_loss(pred, target, *, smoothing=0.1, margin=0.35,
                  scale=64.0, alpha=0.5, tile_b=None):
    B, C = pred.shape
    target2d = target.astype(jnp.int32).reshape(B, 1)

    if tile_b is None:
        tile_b = _choose_tile_b(B, C, jnp.dtype(pred.dtype).itemsize)
    tile_b = max(8, (int(tile_b) // 8) * 8)

    b_pad = ((B + tile_b - 1) // tile_b) * tile_b
    if b_pad != B:
        pred = jnp.pad(pred, ((0, b_pad - B), (0, 0)))
        target2d = jnp.pad(target2d, ((0, b_pad - B), (0, 0)))

    grid = (b_pad // tile_b,)

    kernel = functools.partial(
        _combined_loss_kernel,
        smoothing=float(smoothing),
        cos_m=float(math.cos(margin)),
        sin_m=float(math.sin(margin)),
        scale=float(scale),
        alpha=float(alpha),
        n_valid=int(B),
        n_classes=int(C),
    )

    out = pl.pallas_call(
        kernel,
        out_shape=jax.ShapeDtypeStruct((1, 1), jnp.float32),
        grid=grid,
        in_specs=[
            pl.BlockSpec((tile_b, C), lambda i: (i, 0)),
            pl.BlockSpec((tile_b, 1), lambda i: (i, 0)),
        ],
        out_specs=pl.BlockSpec(memory_space=pltpu.MemorySpace.SMEM),
        scratch_shapes=[pltpu.SMEM((2,), jnp.float32)],
        compiler_params=pltpu.CompilerParams(
            dimension_semantics=("arbitrary",)),
    )(pred, target2d)
    return out[0, 0]


if __name__ == "__main__":
    key = jax.random.PRNGKey(0)
    k_pred, k_tgt = jax.random.split(key)
    B, C = 14, 32   # B not a multiple of the tile -> exercises padding + accumulation
    pred = jax.random.normal(k_pred, (B, C), dtype=jnp.float32)
    target = jax.random.randint(k_tgt, (B,), 0, C, dtype=jnp.int32)

    loss = combined_loss(pred, target, tile_b=8)   # 2 grid steps
    jax.block_until_ready(loss)

    # pure-JAX reference matching the PyTorch module
    def ref(pred, target):
        smoothing, margin, scale, alpha = 0.1, 0.35, 64.0, 0.5
        one_hot = jax.nn.one_hot(target, C, dtype=jnp.float32)
        logp = jax.nn.log_softmax(pred, axis=1)
        smooth = one_hot * (1 - smoothing) + smoothing / C
        ls = jnp.mean(jnp.sum(-smooth * logp, axis=1))
        norm = jnp.sqrt(jnp.sum(pred * pred, axis=1, keepdims=True))
        cosine = pred / jnp.maximum(norm, 1e-12)
        sine = jnp.sqrt(1.0 - cosine ** 2)
        phi = cosine * jnp.cos(margin) - sine * jnp.sin(margin)
        out = (one_hot * phi + (1 - one_hot) * cosine) * scale
        logp2 = jax.nn.log_softmax(out, axis=1)
        arc = jnp.mean(jnp.sum(-one_hot * logp2, axis=1))
        return alpha * ls + (1 - alpha) * arc

    ref_loss = ref(pred, target)
    assert jnp.allclose(loss, ref_loss, rtol=1e-4, atol=1e-4), (loss, ref_loss)
    print("KERNEL_OK")
</pallas_src>

<mosaic_0001>
module attributes {stable_mosaic.version = 11 : i64} {
  func.func @_combined_loss_kernel(%arg0: i32, %arg1: memref<8x32xf32, #tpu.memory_space<vmem>>, %arg2: memref<8x1xi32, #tpu.memory_space<vmem>>, %arg3: memref<1x1xf32, #tpu.memory_space<smem>>, %arg4: memref<2xf32, #tpu.memory_space<smem>>) attributes {dimension_semantics = [#tpu.dimension_semantics<arbitrary>], iteration_bounds = array<i64: 2>, scalar_prefetch = 0 : i64, scratch_operands = 1 : i64, tpu.core_type = #tpu.core_type<tc>, window_params = [{transform_indices = @transform_0, window_bounds = array<i64: 8, 32>}, {transform_indices = @transform_1, window_bounds = array<i64: 8, 1>}, {transform_indices = @transform_2, window_bounds = array<i64: 1, 1>}]} {
    %c0_i32 = arith.constant 0 : i32
    %0 = arith.cmpi eq, %arg0, %c0_i32 : i32
    %1 = arith.extui %0 : i1 to i32
    %c0_i32_0 = arith.constant 0 : i32
    %2 = arith.cmpi ne, %1, %c0_i32_0 : i32
    scf.if %2 {
      %cst_29 = arith.constant 0.000000e+00 : f32
      %c0_30 = arith.constant 0 : index
      %101 = memref.load %arg4[%c0_30] : memref<2xf32, #tpu.memory_space<smem>>
      memref.store %cst_29, %arg4[%c0_30] : memref<2xf32, #tpu.memory_space<smem>>
      %cst_31 = arith.constant 0.000000e+00 : f32
      %c1_32 = arith.constant 1 : index
      %102 = memref.load %arg4[%c1_32] : memref<2xf32, #tpu.memory_space<smem>>
      memref.store %cst_31, %arg4[%c1_32] : memref<2xf32, #tpu.memory_space<smem>>
    } else {
    }
    %c0 = arith.constant 0 : index
    %c0_1 = arith.constant 0 : index
    %3 = vector.load %arg1[%c0, %c0_1] : memref<8x32xf32, #tpu.memory_space<vmem>>, vector<8x32xf32>
    %c0_2 = arith.constant 0 : index
    %c0_3 = arith.constant 0 : index
    %4 = vector.load %arg2[%c0_2, %c0_3] : memref<8x1xi32, #tpu.memory_space<vmem>>, vector<8x1xi32>
    %c8_i32 = arith.constant 8 : i32
    %5 = arith.muli %arg0, %c8_i32 : i32
    %6 = tpu.iota {dimensions = array<i32: 0>} : vector<8x1xi32>
    %7 = vector.broadcast %5 : i32 to vector<8x1xi32>
    %8 = arith.addi %7, %6 : vector<8x1xi32>
    %c14_i32 = arith.constant 14 : i32
    %9 = vector.broadcast %c14_i32 : i32 to vector<8x1xi32>
    %10 = arith.cmpi slt, %8, %9 : vector<8x1xi32>
    %11 = arith.extui %10 : vector<8x1xi1> to vector<8x1xi32>
    %12 = arith.sitofp %11 : vector<8x1xi32> to vector<8x1xf32>
    %13 = tpu.iota {dimensions = array<i32: 1>} : vector<8x32xi32>
    %14 = vector.broadcast %4 : vector<8x1xi32> to vector<8x32xi32>
    %15 = arith.cmpi eq, %13, %14 : vector<8x32xi32>
    %cst = arith.constant dense<0.000000e+00> : vector<8xf32>
    %16 = vector.multi_reduction <add>, %3, %cst [1] : vector<8x32xf32> to vector<8xf32>
    %17 = vector.shape_cast %16 : vector<8xf32> to vector<8x1xf32>
    %cst_4 = arith.constant dense<0xFF800000> : vector<8xf32>
    %18 = vector.multi_reduction <maximumf>, %3, %cst_4 [1] : vector<8x32xf32> to vector<8xf32>
    %19 = vector.shape_cast %18 : vector<8xf32> to vector<8x1xf32>
    %20 = vector.broadcast %19 : vector<8x1xf32> to vector<8x32xf32>
    %21 = arith.subf %3, %20 : vector<8x32xf32>
    %22 = math.exp %21 : vector<8x32xf32>
    %cst_5 = arith.constant dense<0.000000e+00> : vector<8xf32>
    %23 = vector.multi_reduction <add>, %22, %cst_5 [1] : vector<8x32xf32> to vector<8xf32>
    %24 = vector.shape_cast %23 : vector<8xf32> to vector<8x1xf32>
    %25 = math.log %24 : vector<8x1xf32>
    %26 = arith.addf %25, %19 : vector<8x1xf32>
    %27 = arith.mulf %3, %3 : vector<8x32xf32>
    %cst_6 = arith.constant dense<0.000000e+00> : vector<8xf32>
    %28 = vector.multi_reduction <add>, %27, %cst_6 [1] : vector<8x32xf32> to vector<8xf32>
    %29 = vector.shape_cast %28 : vector<8xf32> to vector<8x1xf32>
    %cst_7 = arith.constant 0.000000e+00 : f32
    %30 = vector.broadcast %cst_7 : f32 to vector<8x32xf32>
    %31 = arith.select %15, %3, %30 : vector<8x32xi1>, vector<8x32xf32>
    %cst_8 = arith.constant dense<0.000000e+00> : vector<8xf32>
    %32 = vector.multi_reduction <add>, %31, %cst_8 [1] : vector<8x32xf32> to vector<8xf32>
    %33 = vector.shape_cast %32 : vector<8xf32> to vector<8x1xf32>
    %34 = arith.subf %33, %26 : vector<8x1xf32>
    %cst_9 = arith.constant -0.899999976 : f32
    %35 = vector.broadcast %cst_9 : f32 to vector<8x1xf32>
    %36 = arith.mulf %35, %34 : vector<8x1xf32>
    %cst_10 = arith.constant 3.200000e+01 : f32
    %37 = vector.broadcast %cst_10 : f32 to vector<8x1xf32>
    %38 = arith.mulf %37, %26 : vector<8x1xf32>
    %39 = arith.subf %17, %38 : vector<8x1xf32>
    %cst_11 = arith.constant 3.125000e-03 : f32
    %40 = vector.broadcast %cst_11 : f32 to vector<8x1xf32>
    %41 = arith.mulf %40, %39 : vector<8x1xf32>
    %42 = arith.subf %36, %41 : vector<8x1xf32>
    %43 = math.sqrt %29 : vector<8x1xf32>
    %cst_12 = arith.constant 9.99999996E-13 : f32
    %44 = vector.broadcast %cst_12 : f32 to vector<8x1xf32>
    %45 = arith.maximumf %43, %44 : vector<8x1xf32>
    %46 = tpu.reciprocal %45 : vector<8x1xf32> -> vector<8x1xf32>
    %47 = arith.mulf %33, %46 : vector<8x1xf32>
    %48 = arith.mulf %47, %47 : vector<8x1xf32>
    %cst_13 = arith.constant 1.000000e+00 : f32
    %49 = vector.broadcast %cst_13 : f32 to vector<8x1xf32>
    %50 = arith.subf %49, %48 : vector<8x1xf32>
    %cst_14 = arith.constant 0.000000e+00 : f32
    %cst_15 = arith.constant 1.000000e+00 : f32
    %51 = vector.broadcast %cst_14 : f32 to vector<8x1xf32>
    %52 = arith.maximumf %51, %50 : vector<8x1xf32>
    %53 = vector.broadcast %cst_15 : f32 to vector<8x1xf32>
    %54 = arith.minimumf %53, %52 : vector<8x1xf32>
    %55 = math.sqrt %54 : vector<8x1xf32>
    %cst_16 = arith.constant 0.939372718 : f32
    %56 = vector.broadcast %cst_16 : f32 to vector<8x1xf32>
    %57 = arith.mulf %47, %56 : vector<8x1xf32>
    %cst_17 = arith.constant 0.342897803 : f32
    %58 = vector.broadcast %cst_17 : f32 to vector<8x1xf32>
    %59 = arith.mulf %55, %58 : vector<8x1xf32>
    %60 = arith.subf %57, %59 : vector<8x1xf32>
    %cst_18 = arith.constant 6.400000e+01 : f32
    %61 = vector.broadcast %cst_18 : f32 to vector<8x1xf32>
    %62 = arith.mulf %61, %60 : vector<8x1xf32>
    %cst_19 = arith.constant 6.400000e+01 : f32
    %63 = vector.broadcast %cst_19 : f32 to vector<8x1xf32>
    %64 = arith.mulf %63, %46 : vector<8x1xf32>
    %65 = vector.broadcast %64 : vector<8x1xf32> to vector<8x32xf32>
    %66 = arith.mulf %65, %3 : vector<8x32xf32>
    %67 = vector.shape_cast %62 : vector<8x1xf32> to vector<8x1xf32>
    %68 = vector.broadcast %67 : vector<8x1xf32> to vector<8x32xf32>
    %69 = arith.select %15, %68, %66 : vector<8x32xi1>, vector<8x32xf32>
    %cst_20 = arith.constant dense<0xFF800000> : vector<8xf32>
    %70 = vector.multi_reduction <maximumf>, %69, %cst_20 [1] : vector<8x32xf32> to vector<8xf32>
    %71 = vector.shape_cast %70 : vector<8xf32> to vector<8x1xf32>
    %72 = vector.broadcast %71 : vector<8x1xf32> to vector<8x32xf32>
    %73 = arith.subf %69, %72 : vector<8x32xf32>
    %74 = math.exp %73 : vector<8x32xf32>
    %cst_21 = arith.constant dense<0.000000e+00> : vector<8xf32>
    %75 = vector.multi_reduction <add>, %74, %cst_21 [1] : vector<8x32xf32> to vector<8xf32>
    %76 = vector.shape_cast %75 : vector<8xf32> to vector<8x1xf32>
    %77 = math.log %76 : vector<8x1xf32>
    %78 = arith.addf %77, %71 : vector<8x1xf32>
    %cst_22 = arith.constant 6.400000e+01 : f32
    %79 = vector.broadcast %cst_22 : f32 to vector<8x1xf32>
    %80 = arith.mulf %79, %60 : vector<8x1xf32>
    %81 = arith.subf %78, %80 : vector<8x1xf32>
    %c0_23 = arith.constant 0 : index
    %82 = memref.load %arg4[%c0_23] : memref<2xf32, #tpu.memory_space<smem>>
    %83 = arith.mulf %42, %12 : vector<8x1xf32>
    %84 = vector.shape_cast %83 : vector<8x1xf32> to vector<1x8x1xf32>
    %cst_24 = arith.constant dense<0.000000e+00> : vector<1xf32>
    %85 = vector.multi_reduction <add>, %84, %cst_24 [1, 2] : vector<1x8x1xf32> to vector<1xf32>
    %86 = vector.shape_cast %85 : vector<1xf32> to vector<1x1x1xf32>
    %87 = vector.extract %86[0, 0, 0] : f32 from vector<1x1x1xf32>
    %88 = arith.addf %82, %87 : f32
    %c0_25 = arith.constant 0 : index
    %89 = memref.load %arg4[%c0_25] : memref<2xf32, #tpu.memory_space<smem>>
    memref.store %88, %arg4[%c0_25] : memref<2xf32, #tpu.memory_space<smem>>
    %c1 = arith.constant 1 : index
    %90 = memref.load %arg4[%c1] : memref<2xf32, #tpu.memory_space<smem>>
    %91 = arith.mulf %81, %12 : vector<8x1xf32>
    %92 = vector.shape_cast %91 : vector<8x1xf32> to vector<1x8x1xf32>
    %cst_26 = arith.constant dense<0.000000e+00> : vector<1xf32>
    %93 = vector.multi_reduction <add>, %92, %cst_26 [1, 2] : vector<1x8x1xf32> to vector<1xf32>
    %94 = vector.shape_cast %93 : vector<1xf32> to vector<1x1x1xf32>
    %95 = vector.extract %94[0, 0, 0] : f32 from vector<1x1x1xf32>
    %96 = arith.addf %90, %95 : f32
    %c1_27 = arith.constant 1 : index
    %97 = memref.load %arg4[%c1_27] : memref<2xf32, #tpu.memory_space<smem>>
    memref.store %96, %arg4[%c1_27] : memref<2xf32, #tpu.memory_space<smem>>
    %c1_i32 = arith.constant 1 : i32
    %98 = arith.cmpi eq, %arg0, %c1_i32 : i32
    %99 = arith.extui %98 : i1 to i32
    %c0_i32_28 = arith.constant 0 : i32
    %100 = arith.cmpi ne, %99, %c0_i32_28 : i32
    scf.if %100 {
      %c0_29 = arith.constant 0 : index
      %101 = memref.load %arg4[%c0_29] : memref<2xf32, #tpu.memory_space<smem>>
      %cst_30 = arith.constant 5.000000e-01 : f32
      %102 = arith.mulf %cst_30, %101 : f32
      %c1_31 = arith.constant 1 : index
      %103 = memref.load %arg4[%c1_31] : memref<2xf32, #tpu.memory_space<smem>>
      %cst_32 = arith.constant 5.000000e-01 : f32
      %104 = arith.mulf %cst_32, %103 : f32
      %105 = arith.addf %102, %104 : f32
      %cst_33 = arith.constant 0.0714285746 : f32
      %106 = arith.mulf %105, %cst_33 : f32
      %c0_34 = arith.constant 0 : index
      %c0_35 = arith.constant 0 : index
      %107 = memref.load %arg3[%c0_34, %c0_35] : memref<1x1xf32, #tpu.memory_space<smem>>
      memref.store %106, %arg3[%c0_34, %c0_35] : memref<1x1xf32, #tpu.memory_space<smem>>
    } else {
    }
    return
  }
  func.func @transform_0(%arg0: i32) -> (i32, i32) {
    %c0_i32 = arith.constant 0 : i32
    %c0_i32_0 = arith.constant 0 : i32
    return %arg0, %c0_i32 : i32, i32
  }
  func.func @transform_1(%arg0: i32) -> (i32, i32) {
    %c0_i32 = arith.constant 0 : i32
    %c0_i32_0 = arith.constant 0 : i32
    return %arg0, %c0_i32 : i32, i32
  }
  func.func @transform_2(%arg0: i32) -> (i32, i32) {
    %c0_i32 = arith.constant 0 : i32
    %c0_i32_0 = arith.constant 0 : i32
    %c0_i32_1 = arith.constant 0 : i32
    return %c0_i32, %c0_i32_0 : i32, i32
  }
}

</mosaic_0001>

<bundles_post_ra>
// kernel: tpu_custom_call.1
= control target key start
LH: loop header
LB: loop body
LE: loop exit
PB: predicated region body
PF: predicated region fallthrough
CT: control target
= control target key end

     0   :  { %7 = vsyncpa [#allocation4], 0  ;;  %s440_s9 = smov 0   ;;  %s487_s0 = inlined_call_operand.vmem [shape: f32[16,32], index: 0, kind: input, shape index: {}]   ;;  %s488_s1 = inlined_call_operand.vmem [shape: s32[16,1], index: 1, kind: input, shape index: {}]   ;;  %s489_s2 = inlined_call_operand.hbm [shape: f32[1,1], index: 2, kind: output, shape index: {}]  }
   0x1 LB: > { %s446_s10 = sadd.s32 4294967295, %s419_s9   ;;  %p342_p0 = scmp.ge.s32.totalorder %s419_s9, 1  ;;  %s419_s9 = sphi %s440_s9, %s13_s9  }
   0x2   : > { %p116_p1 = scmp.lt.s32.totalorder %s419_s9, 3 }
   0x4   : > { %p117_p2 = pnand %p342_p0, %p116_p1 }
   0x5   : > { %p136_p3 = scmp.lt.s32.totalorder (!%p117_p2), %s446_s10, 1  ;;  %s346_s19 = sshll.u32 (!%p117_p2), %s446_s10, 3 }
   0x6   : > { %120 = sbr.rel (%p117_p2) target bundleno = 848 (0x350), region = 28  ;;  %p368_p4 = scmp.eq.s32.totalorder (!%p117_p2), %s446_s10, 0 }
   0x7   : > { %s423_s20 = smov (!%p117_p2), 0.0   ;;  %p369_p5 = scmp.eq.s32.totalorder (!%p117_p2), %s446_s10, 1 }
   0x8   : > { %s424_s3 = smov (!%p117_p2), [#allocation3]  }
   0xb   : > { %v421_v0 = vmov 0   ;;  %s137_s11 = scalar_select %p136_p3, %s446_s10, 1  ;;  %vm168_vm0 = vcmask 261120   ;;  %v155_v5 = vlaneseq  ;;  %v157_v53 = vstv %s346_s19 }
   0xc   : > { %384 = vset.pattern.permute.xlu0 %v421_v0  ;;  %v422_v63 = vmov 0.0   ;;  %vm241_vm7 = vcmask 7168   ;;  %360 = sst [smem:[#allocation2]] (%p368_p4), %s423_s20 }
   0xd   : > { %s343_s12 = sshll.u32 %s137_s11, 3  ;;  %v163_v6 = vand.u32 127, %v155_v5  ;;  %v156_v52 = vshrl.u32 %v155_v5, 7  ;;  %361 = sst [smem:[#allocation2 + $0x1]] (%p368_p4), %s423_s20 }
   0xe   : > { %s143_s15 = scalar_lea.vmem %s488_s1, %s343_s12  ;;  %s139_s18 = scalar_lea.vmem %s487_s0, %s343_s12 }
   0xf   : > { %v153_v1 = vld [vmem:[%s143_s15] sm:$0xff]  ;;  %v158_v56 = vadd.s32 %v157_v53, %v156_v52  ;;  %s239_s21 = sld [smem:[#allocation2]] }
  0x10   : > { %165 = vperm.xlu0 %384, %v153_v1   ;;  %v458_v2 = vld [vmem:[%s139_s18] sm:$0xff]  ;;  %s348_s24 = sld [smem:[#allocation2 + $0x1]] }
  0x11   : > { %v184_v3 = vmul.f32 %v458_v2, %v458_v2  ;;  %v172_v10 = vsel %vm168_vm0, %v458_v2, -inf  ;;  %v169_v48 = vsel %vm168_vm0, %v458_v2, 0.0  ;;  %vm159_vm6 = vcmp.lt.s32.totalorder %v158_v56, 14 }
  0x12   : > { %v347_v0 = vsel %vm159_vm6, 1.0, %v422_v63 }
  0x13   : > { %v185_v4 = vsel %vm168_vm0, %v184_v3, 0.0 }
  0x2f   : > { %186 = vadd.xlane.f32.xlu0 %v185_v4 }
  0x8b   : > { %v166_v7 = vpop.permute.xlu0 %165 }
  0x8c   : > { %vm167_vm1 = vcmp.eq.s32.totalorder %v163_v6, %v166_v7 }
  0x8d   : > { %v188_v8 = vsel %vm167_vm1, %v458_v2, 0.0 }
  0x8e   : > { %v189_v9 = vsel %vm168_vm0, %v188_v8, 0.0 }
  0x8f   : > { %190 = vadd.xlane.f32.xlu1 %v189_v9 }
  0x93   : > { %173 = vmax.xlane.f32.xlu1 %v172_v10 }
  0xb8   : > { %v187_v11 = vpop.xlane.xlu0 %186 }
  0xb9   : > { %385 = vrsqrt.f32 %v187_v11  ;;  %vm200_vm2 = vcmp.eq.f32.partialorder %v187_v11, inf  ;;  %v203_v14 = vand.u32 2147483648, %v187_v11  ;;  %vm202_vm3 = vcmp.eq.f32.partialorder %v187_v11, 0.0 }
  0xc6   : > { %v386_v12 = vpop.eup %385 }
  0xc7   : > { %v199_v13 = vmul.f32 %v386_v12, %v187_v11 }
  0xc9   : > { %v201_v15 = vsel %vm200_vm2, %v187_v11, %v199_v13 }
  0xca   : > { %v204_v16 = vsel %vm202_vm3, %v203_v14, %v201_v15 }
  0xcb   : > { %v205_v17 = vmax.f32 %v204_v16, 1e-12 }
  0xcd   : > { %387 = vrcp.f32 %v205_v17 }
  0xda   : > { %v388_v18 = vpop.eup %387 }
  0xdb   : > { %v223_v35 = vmul.f32 64.0, %v388_v18 }
  0xdd   : > { %v224_v38 = vmul.f32 %v223_v35, %v458_v2 }
 0x118   : > { %v191_v19 = vpop.xlane.xlu1 %190 }
 0x119   : > { %v207_v20 = vmul.f32 %v388_v18, %v191_v19 }
 0x11b   : > { %v208_v21 = vmul.f32 %v207_v20, %v207_v20  ;;  %v219_v33 = vmul.f32 0.9393727, %v207_v20 }
 0x11c   : > { %v174_v25 = vpop.xlane.xlu1 %173 }
 0x11d   : > { %v209_v22 = vsub.f32 1.0, %v208_v21  ;;  %v175_v26 = vsub.f32 %v458_v2, %v174_v25 }
 0x11f   : > { %v210_v23 = vmax.f32 %v209_v22, 0.0  ;;  %v176_v27 = vmul.f32 1.442695, %v175_v26 }
 0x121   : > { %v211_v24 = vmin.f32 %v210_v23, 1.0 }
 0x123   : > { %389 = vrsqrt.f32 %v211_v24  ;;  %vm214_vm4 = vcmp.eq.f32.partialorder %v211_v24, inf  ;;  %v217_v30 = vand.u32 2147483648, %v211_v24  ;;  %vm216_vm5 = vcmp.eq.f32.partialorder %v211_v24, 0.0 }
 0x124   : > { %391 = vpow2.f32 %v176_v27 }
 0x130   : > { %v390_v28 = vpop.eup %389 }
 0x131   : > { %v213_v29 = vmul.f32 %v390_v28, %v211_v24  ;;  %v392_v39 = vpop.eup %391 }
 0x132   : > { %v178_v42 = vsel %vm168_vm0, %v392_v39, 0.0 }
 0x133   : > { %v215_v31 = vsel %vm214_vm4, %v211_v24, %v213_v29 }
 0x134   : > { %v218_v32 = vsel %vm216_vm5, %v217_v30, %v215_v31 }
 0x135   : > { %v220_v34 = vmul.f32 0.3428978, %v218_v32 }
 0x137   : > { %v221_v36 = vsub.f32 %v219_v33, %v220_v34 }
 0x139   : > { %v222_v37 = vmul.f32 64.0, %v221_v36 }
 0x13b   : > { %v225_v40 = vsel %vm167_vm1, %v222_v37, %v224_v38 }
 0x13c   : > { %v226_v41 = vsel %vm168_vm0, %v225_v40, -inf }
 0x13d   : > { %227 = vmax.xlane.f32.xlu1 %v226_v41 }
 0x141   : > { %179 = vadd.xlane.f32.xlu1 %v178_v42 }
 0x1c6   : > { %v228_v43 = vpop.xlane.xlu1 %227 }
 0x1c7   : > { %v229_v44 = vsub.f32 %v225_v40, %v228_v43 }
 0x1c9   : > { %v230_v45 = vmul.f32 1.442695, %v229_v44 }
 0x1ca   : > { %v180_v49 = vpop.xlane.xlu1 %179 }
 0x1cb   : > { %393 = vpow2.f32 %v230_v45 }
 0x1cc   : > { %395 = vlog2.f32 %v180_v49 }
 0x1d8   : > { %v394_v46 = vpop.eup %393 }
 0x1d9   : > { %v232_v47 = vsel %vm168_vm0, %v394_v46, 0.0  ;;  %v396_v50 = vpop.eup %395 }
 0x1da   : > { %233 = vadd.xlane.f32.xlu1 %v232_v47  ;;  %v182_v51 = vmul.f32 0.6931472, %v396_v50 }
 0x1dc   : > { %v183_v54 = vadd.f32 %v182_v51, %v174_v25 }
 0x1de   : > { %170 = vadd.xlane.f32.xlu1 %v169_v48  ;;  %v192_v57 = vsub.f32 %v191_v19, %v183_v54  ;;  %v194_v58 = vmul.f32 32.0, %v183_v54 }
 0x1e0   : > { %v193_v61 = vmul.f32 -0.9, %v192_v57 }
 0x263   : > { %v234_v55 = vpop.xlane.xlu1 %233 }
 0x264   : > { %397 = vlog2.f32 %v234_v55 }
 0x267   : > { %v171_v59 = vpop.xlane.xlu1 %170 }
 0x268   : > { %v195_v60 = vsub.f32 %v171_v59, %v194_v58 }
 0x26a   : > { %v196_v62 = vmul.f32 0.003125, %v195_v60 }
 0x26c   : > { %v197_v1 = vsub.f32 %v193_v61, %v196_v62 }
 0x26e   : > { %v240_v2 = vmul.f32 %v347_v0, %v197_v1 }
 0x270   : > { %v242_v3 = vsel %vm241_vm7, %v240_v2, 0.0 }
 0x271   : > { %v398_v4 = vpop.eup %397  ;;  %243 = vadd.xlane.f32.xlu1 %v242_v3 }
 0x272   : > { %v236_v5 = vmul.f32 0.6931472, %v398_v4 }
 0x274   : > { %v237_v6 = vadd.f32 %v236_v5, %v228_v43 }
 0x276   : > { %v238_v7 = vsub.f32 %v237_v6, %v222_v37 }
 0x278   : > { %v256_v8 = vmul.f32 %v347_v0, %v238_v7 }
 0x27a   : > { %v257_v9 = vsel %vm241_vm7, %v256_v8, 0.0 }
 0x27b   : > { %258 = vadd.xlane.f32.xlu1 %v257_v9 }
 0x2fa   : > { %v244_v10 = vpop.xlane.xlu1 %243 }
 0x2fb   : > { %v245_v11 = vrot.slane %v244_v10, 4 }
 0x2fd   : > { %v246_v12 = vadd.f32 %v245_v11, %v244_v10 }
 0x2ff   : > { %v247_v13 = vrot.slane %v246_v12, 2 }
 0x301   : > { %v248_v14 = vadd.f32 %v247_v13, %v246_v12 }
 0x303   : > { %v249_v15 = vrot.slane %v248_v14, 1 }
 0x304   : > { %v259_v16 = vpop.xlane.xlu1 %258 }
 0x305   : > { %v260_v17 = vrot.slane %v259_v16, 4  ;;  %v250_v18 = vadd.f32 %v249_v15, %v248_v14 }
 0x307   : > { %v261_v19 = vadd.f32 %v260_v17, %v259_v16  ;;  %355 = vpush %v250_v18 }
 0x309   : > { %v262_v20 = vrot.slane %v261_v19, 2 }
 0x30b   : > { %v263_v21 = vadd.f32 %v262_v20, %v261_v19 }
 0x30d   : > { %v264_v22 = vrot.slane %v263_v21, 1 }
 0x30f   : > { %v265_v23 = vadd.f32 %v264_v22, %v263_v21 }
 0x311   : > { %357 = vpush %v265_v23 }
 0x338   : > { %s356_s22 = spop %355 }
 0x339   : > { %s252_s23 = sadd.f32 %s356_s22, %s239_s21 }
 0x33b   : > { %254 = sst [smem:[#allocation2]] %s252_s23  ;;  %s275_s27 = smul.f32 0.5, %s252_s23 }
 0x342   : > { %s358_s25 = spop %357 }
 0x343   : > { %s267_s26 = sadd.f32 %s358_s25, %s348_s24 }
 0x345   : > { %269 = sst [smem:[#allocation2 + $0x1]] %s267_s26  ;;  %s277_s28 = smul.f32 0.5, %s267_s26 }
 0x347   : > { %s278_s29 = sadd.f32 %s277_s28, %s275_s27 }
 0x349   : > { %s279_s30 = smul.f32 0.071428575, %s278_s29 }
 0x34b   : > { %363 = sst [smem:[#allocation3]] (%p369_p5), %s279_s30 }
 0x34c   : > { %365 = dma.smem_to_hbm (%p369_p5), %s424_s3, 16, %s489_s2, [#allocation4]  }
 0x34d   : > { %414 = dma.done.wait (%p369_p5), [#allocation4], 16  }
 0x34e   : > { %416 = vsyncadd (%p369_p5), [#allocation4], 4294967280 }
 0x34f   : > { %295 = sfence }
 0x350 PF: > { %s13_s9 = sadd.s32 1, %s419_s9  }
 0x351   : > { %p10_p6 = scmp.ge.s32.totalorder %s13_s9, 4  }
 0x353   :  { %12 = sbr.rel (!%p10_p6) target bundleno = 1 (0x1), region = 71 }
 0x358   :  { %301 = vsyncpa [#allocation4], 1 }
 0x359   :  { %303 = vsyncpa [#allocation4 + $0x1], 1 }

</bundles_post_ra>
